<compile_context>
chip_gen: v5e
topology: v5e:2x2
jax: 0.10.0
libtpu: 0.0.40
codegen_flags: <defaults>
</compile_context>

<pallas_src>
import functools

import jax
import jax.numpy as jnp
from jax.experimental import pallas as pl
from jax.experimental.pallas import tpu as pltpu


def _round_up(x, m):
    return ((x + m - 1) // m) * m


def _cdiv(a, b):
    return -(-a // b)


def _vmem_capacity_bytes():
    """Per-core VMEM capacity (128 MiB on v5e/v6e, 64 MiB on v7x)."""
    try:
        cap = int(pltpu.get_tpu_info().vmem_capacity_bytes)
        if cap > 0:
            return cap
    except Exception:
        pass
    return 64 * 1024 * 1024  # conservative fallback (v7x per-core physical)


def _make_kernel(K, T, T_out, padding):
    """Builds the per-tile kernel.  K/T/T_out/padding are static Python ints."""
    if padding == 0:
        def kernel(x_ref, w_ref, b_ref, o_ref):
            # x_ref: (row_tile, T)      unpadded input rows
            # w_ref: (row_tile, K)      per-row kernel taps
            # b_ref: (row_tile, 1)      per-row bias
            # o_ref: (row_tile, T_out)  output rows (last dim == full array dim)
            wv = w_ref[...].astype(jnp.float32)
            # bias folded into the first tap; per-tap operands are ref slices.
            acc = (wv[:, 0:1] * x_ref[:, pl.ds(0, T_out)].astype(jnp.float32)
                   + b_ref[...].astype(jnp.float32))
            for k in range(1, K):            # K is small & static -> unrolled
                acc = acc + wv[:, k:k + 1] * x_ref[:, pl.ds(k, T_out)].astype(jnp.float32)
            o_ref[...] = acc.astype(o_ref.dtype)
        return kernel

    def kernel(x_ref, w_ref, b_ref, o_ref, xp_ref):
        # xp_ref: (row_tile, Wp) VMEM scratch holding the halo-padded rows.
        # Only the 2*padding halo columns need explicit zeros; they are
        # re-written every step (tiny masked stores) so the kernel stays
        # correct when the parallel grid axis is sharded across TensorCores.
        row_tile = xp_ref.shape[0]
        halo = jnp.zeros((row_tile, padding), xp_ref.dtype)
        xp_ref[:, 0:padding] = halo
        xp_ref[:, padding + T:padding + T + padding] = halo
        xp_ref[:, padding:padding + T] = x_ref[...]

        wv = w_ref[...].astype(jnp.float32)
        acc = (wv[:, 0:1] * xp_ref[:, pl.ds(0, T_out)].astype(jnp.float32)
               + b_ref[...].astype(jnp.float32))
        for k in range(1, K):
            acc = acc + wv[:, k:k + 1] * xp_ref[:, pl.ds(k, T_out)].astype(jnp.float32)
        o_ref[...] = acc.astype(o_ref.dtype)
    return kernel


@functools.partial(jax.jit, static_argnames=("padding", "heads", "weight_softmax"))
def lightweight_conv1d(x, weight, bias, *, padding=0, heads=1, weight_softmax=False):
    """Forward pass equivalent to _LightweightConv1d.forward.

    x:      (B, C, T)        (dtype preserved; bf16 inputs halve HBM traffic)
    weight: (H, 1, K)
    bias:   (C,) or None
    returns (B, C, T + 2*padding - K + 1)
    """
    B, C, T = x.shape
    H = heads
    K = weight.shape[-1]
    assert (B * C) % H == 0, "B*C must be divisible by heads (same as view(-1, H, T))"
    T_out = T + 2 * padding - K + 1
    assert T_out >= 1, "kernel_size too large for this input length / padding"

    w = weight.reshape(H, K)
    if weight_softmax:
        w = jax.nn.softmax(w, axis=-1)

    R = B * C
    # Per-row parameter tables: row n -> head n % H, channel n % C.  Tiny
    # (R*(K+1) elements) and streamed per tile, so row_tile is unconstrained.
    w_rows = jnp.tile(w, (R // H, 1))                              # (R, K)
    if bias is None:
        b_rows = jnp.zeros((R, 1), x.dtype)
    else:
        b_rows = jnp.tile(bias.reshape(C), (B,)).reshape(R, 1)     # (R, 1)

    x2d = x.reshape(R, T)   # contiguous -> metadata-only reshape, no HBM pass

    itemsize = jnp.dtype(x.dtype).itemsize
    Wp = _round_up(T + 2 * padding, 128) if padding > 0 else 0     # halo scratch width

    # Per-row VMEM footprint of one grid step: double-buffered in/out/w/b
    # blocks + single-buffered halo scratch + f32 accumulator slack.
    bytes_per_row = (2 * itemsize * (T + T_out + K + 1)
                     + itemsize * Wp
                     + 4 * T_out)

    vmem_cap = _vmem_capacity_bytes()
    block_budget = int(vmem_cap * 0.40)     # ~51 MiB on v5e/v6e, ~25 MiB on v7x
    row_tile = max(8, (block_budget // bytes_per_row) // 8 * 8)
    # Keep >= ~4 grid steps when the row count allows it (v7x megacore).
    row_tile = min(row_tile, _round_up(_cdiv(R, 4), 8))
    row_tile = min(row_tile, _round_up(R, 8))
    row_tile = max(row_tile, 8)
    grid = (_cdiv(R, row_tile),)

    vmem_limit = int(min(vmem_cap * 0.75,
                         max(2 * row_tile * bytes_per_row, 32 * 1024 * 1024)))

    scratch = [pltpu.VMEM((row_tile, Wp), x.dtype)] if padding > 0 else []

    kernel = _make_kernel(K, T, T_out, padding)

    cost = pl.CostEstimate(
        flops=2 * K * R * T_out,
        transcendentals=0,
        bytes_accessed=itemsize * R * (T + T_out + K + 1),
    )

    out2d = pl.pallas_call(
        kernel,
        out_shape=jax.ShapeDtypeStruct((R, T_out), x.dtype),
        grid_spec=pltpu.PrefetchScalarGridSpec(
            num_scalar_prefetch=0,
            grid=grid,
            in_specs=[
                pl.BlockSpec((row_tile, T), lambda i: (i, 0)),
                pl.BlockSpec((row_tile, K), lambda i: (i, 0)),
                pl.BlockSpec((row_tile, 1), lambda i: (i, 0)),
            ],
            out_specs=pl.BlockSpec((row_tile, T_out), lambda i: (i, 0)),
            scratch_shapes=scratch,
        ),
        compiler_params=pltpu.CompilerParams(
            dimension_semantics=("parallel",),
            vmem_limit_bytes=vmem_limit),
        cost_estimate=cost,
    )(x2d, w_rows, b_rows)

    return out2d.reshape(B, C, T_out)


def _reference(x, weight, bias, *, padding, heads, weight_softmax):
    """Pure-JAX reference mirroring the PyTorch forward (grouped conv1d)."""
    B, C, T = x.shape
    H = heads
    K = weight.shape[-1]
    w = weight.reshape(H, 1, K)
    if weight_softmax:
        w = jax.nn.softmax(w, axis=-1)
    x_r = x.reshape(-1, H, T)
    out = jax.lax.conv_general_dilated(
        x_r, w, window_strides=(1,), padding=[(padding, padding)],
        feature_group_count=H, dimension_numbers=("NCH", "OIH", "NCH"))
    out = out.reshape(B, C, -1)
    if bias is not None:
        out = out + bias.reshape(1, C, 1)
    return out


def _run_case(key, B, C, T, H, K, P, weight_softmax, bias_mode):
    k_x, k_w, k_b = jax.random.split(key, 3)
    x = jax.random.normal(k_x, (B, C, T), dtype=jnp.float32)

    # weight: xavier_uniform_ on shape (heads, 1, kernel_size)
    fan_in, fan_out = 1 * K, H * K
    bound = (6.0 / (fan_in + fan_out)) ** 0.5
    weight = jax.random.uniform(k_w, (H, 1, K), jnp.float32, -bound, bound)
    if bias_mode == "none":
        bias = None
    elif bias_mode == "zero":
        bias = jnp.zeros((C,), jnp.float32)            # module init value
    else:
        bias = jax.random.normal(k_b, (C,), jnp.float32)

    out = lightweight_conv1d(x, weight, bias, padding=P, heads=H,
                             weight_softmax=weight_softmax)
    out = jax.block_until_ready(out)
    ref = _reference(x, weight, bias, padding=P, heads=H,
                     weight_softmax=weight_softmax)

    assert out.shape == (B, C, T + 2 * P - K + 1), out.shape
    assert jnp.allclose(out, ref, atol=1e-5, rtol=1e-5), \
        f"max err = {float(jnp.max(jnp.abs(out - ref)))}"


if __name__ == "__main__":
    key = jax.random.PRNGKey(0)
    k1, k2, k3 = jax.random.split(key, 3)

    # Case 1: small, faithful to module defaults (bias initialized to 0),
    # exercises the padding>0 (halo-scratch) path.
    _run_case(k1, B=2, C=4, T=16, H=2, K=3, P=1,
              weight_softmax=True, bias_mode="zero")

    # Case 2: non-trivial T (non-128-aligned output width) + nonzero bias.
    _run_case(k2, B=4, C=8, T=300, H=4, K=5, P=2,
              weight_softmax=False, bias_mode="random")

    # Case 3: padding == 0 path, bias=None, row count not a multiple of the
    # row tile (exercises the partial last block / masked writeback).
    _run_case(k3, B=3, C=5, T=50, H=5, K=3, P=0,
              weight_softmax=False, bias_mode="none")

    print("KERNEL_OK")
</pallas_src>

<mosaic_0001>
module attributes {stable_mosaic.version = 11 : i64} {
  func.func @kernel(%arg0: i32, %arg1: memref<8x16xf32, #tpu.memory_space<vmem>>, %arg2: memref<8x3xf32, #tpu.memory_space<vmem>>, %arg3: memref<8x1xf32, #tpu.memory_space<vmem>>, %arg4: memref<8x16xf32, #tpu.memory_space<vmem>>, %arg5: memref<8x128xf32, #tpu.memory_space<vmem>>) attributes {dimension_semantics = [#tpu.dimension_semantics<parallel>], iteration_bounds = array<i64: 1>, scalar_prefetch = 0 : i64, scratch_operands = 1 : i64, tpu.core_type = #tpu.core_type<tc>, window_params = [{transform_indices = @transform_0, window_bounds = array<i64: 8, 16>}, {transform_indices = @transform_1, window_bounds = array<i64: 8, 3>}, {transform_indices = @transform_2, window_bounds = array<i64: 8, 1>}, {transform_indices = @transform_3, window_bounds = array<i64: 8, 16>}]} {
    %cst = arith.constant 0.000000e+00 : f32
    %0 = vector.broadcast %cst : f32 to vector<8x1xf32>
    %c0 = arith.constant 0 : index
    %c0_0 = arith.constant 0 : index
    %1 = vector.load %arg5[%c0, %c0_0] : memref<8x128xf32, #tpu.memory_space<vmem>>, vector<8x1xf32>
    tpu.vector_store %arg5[%c0, %c0_0], %0 {strides = array<i32>} : memref<8x128xf32, #tpu.memory_space<vmem>>, vector<8x1xf32>,
    %c0_1 = arith.constant 0 : index
    %c17 = arith.constant 17 : index
    %2 = vector.load %arg5[%c0_1, %c17] : memref<8x128xf32, #tpu.memory_space<vmem>>, vector<8x1xf32>
    tpu.vector_store %arg5[%c0_1, %c17], %0 {strides = array<i32>} : memref<8x128xf32, #tpu.memory_space<vmem>>, vector<8x1xf32>,
    %c0_2 = arith.constant 0 : index
    %c0_3 = arith.constant 0 : index
    %3 = vector.load %arg1[%c0_2, %c0_3] : memref<8x16xf32, #tpu.memory_space<vmem>>, vector<8x16xf32>
    %c0_4 = arith.constant 0 : index
    %c1 = arith.constant 1 : index
    %4 = vector.load %arg5[%c0_4, %c1] : memref<8x128xf32, #tpu.memory_space<vmem>>, vector<8x16xf32>
    tpu.vector_store %arg5[%c0_4, %c1], %3 {strides = array<i32>} : memref<8x128xf32, #tpu.memory_space<vmem>>, vector<8x16xf32>,
    %c0_5 = arith.constant 0 : index
    %c0_6 = arith.constant 0 : index
    %5 = vector.load %arg2[%c0_5, %c0_6] : memref<8x3xf32, #tpu.memory_space<vmem>>, vector<8x3xf32>
    %6 = vector.extract_strided_slice %5 {offsets = [0, 0], sizes = [8, 1], strides = [1, 1]} : vector<8x3xf32> to vector<8x1xf32>
    %c0_7 = arith.constant 0 : index
    %c0_8 = arith.constant 0 : index
    %7 = vector.load %arg5[%c0_7, %c0_8] : memref<8x128xf32, #tpu.memory_space<vmem>>, vector<8x16xf32>
    %8 = vector.broadcast %6 : vector<8x1xf32> to vector<8x16xf32>
    %9 = arith.mulf %8, %7 : vector<8x16xf32>
    %c0_9 = arith.constant 0 : index
    %c0_10 = arith.constant 0 : index
    %10 = vector.load %arg3[%c0_9, %c0_10] : memref<8x1xf32, #tpu.memory_space<vmem>>, vector<8x1xf32>
    %11 = vector.broadcast %10 : vector<8x1xf32> to vector<8x16xf32>
    %12 = arith.addf %9, %11 : vector<8x16xf32>
    %13 = vector.extract_strided_slice %5 {offsets = [0, 1], sizes = [8, 1], strides = [1, 1]} : vector<8x3xf32> to vector<8x1xf32>
    %c0_11 = arith.constant 0 : index
    %c1_12 = arith.constant 1 : index
    %14 = vector.load %arg5[%c0_11, %c1_12] : memref<8x128xf32, #tpu.memory_space<vmem>>, vector<8x16xf32>
    %15 = vector.broadcast %13 : vector<8x1xf32> to vector<8x16xf32>
    %16 = arith.mulf %15, %14 : vector<8x16xf32>
    %17 = arith.addf %12, %16 : vector<8x16xf32>
    %18 = vector.extract_strided_slice %5 {offsets = [0, 2], sizes = [8, 1], strides = [1, 1]} : vector<8x3xf32> to vector<8x1xf32>
    %c0_13 = arith.constant 0 : index
    %c2 = arith.constant 2 : index
    %19 = vector.load %arg5[%c0_13, %c2] : memref<8x128xf32, #tpu.memory_space<vmem>>, vector<8x16xf32>
    %20 = vector.broadcast %18 : vector<8x1xf32> to vector<8x16xf32>
    %21 = arith.mulf %20, %19 : vector<8x16xf32>
    %22 = arith.addf %17, %21 : vector<8x16xf32>
    %c0_14 = arith.constant 0 : index
    %c0_15 = arith.constant 0 : index
    %23 = vector.load %arg4[%c0_14, %c0_15] : memref<8x16xf32, #tpu.memory_space<vmem>>, vector<8x16xf32>
    tpu.vector_store %arg4[%c0_14, %c0_15], %22 {strides = array<i32>} : memref<8x16xf32, #tpu.memory_space<vmem>>, vector<8x16xf32>,
    return
  }
  func.func @transform_0(%arg0: i32) -> (i32, i32) {
    %c0_i32 = arith.constant 0 : i32
    %c0_i32_0 = arith.constant 0 : i32
    return %arg0, %c0_i32 : i32, i32
  }
  func.func @transform_1(%arg0: i32) -> (i32, i32) {
    %c0_i32 = arith.constant 0 : i32
    %c0_i32_0 = arith.constant 0 : i32
    return %arg0, %c0_i32 : i32, i32
  }
  func.func @transform_2(%arg0: i32) -> (i32, i32) {
    %c0_i32 = arith.constant 0 : i32
    %c0_i32_0 = arith.constant 0 : i32
    return %arg0, %c0_i32 : i32, i32
  }
  func.func @transform_3(%arg0: i32) -> (i32, i32) {
    %c0_i32 = arith.constant 0 : i32
    %c0_i32_0 = arith.constant 0 : i32
    return %arg0, %c0_i32 : i32, i32
  }
}

</mosaic_0001>

<bundles_post_ra>
// kernel: tile.18
= control target key start
LH: loop header
LB: loop body
LE: loop exit
PB: predicated region body
PF: predicated region fallthrough
CT: control target
= control target key end

     0   :  { %s22_s0 = inlined_call_operand.vmem [shape: f32[4], index: 0, kind: input, shape index: {}]   ;;  %s23_s1 = inlined_call_operand.vmem [shape: f32[2,4], index: 1, kind: output, shape index: {}]  }
   0x1   :  { %v4_v0 = vld [vmem:[%s22_s0] ss:$0 sm:$0xff] }
   0x2   :  { %5 = vst [vmem:[%s23_s1] sm:$0x3] %v4_v0 }

// kernel: tile.0
= control target key start
LH: loop header
LB: loop body
LE: loop exit
PB: predicated region body
PF: predicated region fallthrough
CT: control target
= control target key end

     0   :  { %s34_s8 = smov 125   ;;  %s35_s9 = smov 126   ;;  %vm7_vm0 = vcmask 7168   ;;  %s61_s0 = inlined_call_operand.vmem [shape: f32[2,4], index: 0, kind: input, shape index: {}]   ;;  %s62_s1 = inlined_call_operand.vmem [shape: f32[8,1], index: 1, kind: output, shape index: {}]  }
   0x1   :  { %v4_v0 = vld [vmem:[%s61_s0] sm:$0x3]  ;;  %s33_s0 = smov 127  }
   0x2   :  { %5 = vst [vmem:[#allocation0] sm:$0x3] %v4_v0 }
   0x9   :  { %v9_v1 = vld [vmem:[#allocation0] sm:$0x3]  }
   0xa   :  { %v21_v2 = vld [vmem:[#allocation0] sm:$0x3]   ;;  %10 = vrot.lane.b32.xlu0 %v9_v1, %s33_s0 }
   0xb   :  { %22 = vrot.lane.b32.xlu1 %v21_v2, %s34_s8  ;;  %v15_v3 = vld [vmem:[#allocation0] sm:$0x3]  }
   0xc   :  { %v6_v4 = vld [vmem:[#allocation0] sm:$0x3]  }
   0xd   :  { %8 = vst.msk [vmem:[%s62_s1] ss:$4 sm:$0x3] %vm7_vm0, %v6_v4  }
  0x12   :  { %16 = vrot.lane.b32.xlu0 %v15_v3, %s35_s9 }
  0x7c   :  { %v11_v5 = vpop.permute.xlu0 %10  }
  0x7d   :  { %v23_v6 = vpop.permute.xlu1 %22   ;;  %27 = vst.msk [vmem:[%s62_s1 + $0x1] ss:$4 sm:$0x3] %vm7_vm0, %v11_v5  }
  0x7e   :  { %29 = vst.msk [vmem:[%s62_s1 + $0x3] ss:$4 sm:$0x3] %vm7_vm0, %v23_v6  }
  0x84   :  { %v17_v7 = vpop.permute.xlu0 %16  }
  0x85   :  { %28 = vst.msk [vmem:[%s62_s1 + $0x2] ss:$4 sm:$0x3] %vm7_vm0, %v17_v7  }

// kernel: lightweight_conv1d.1
= control target key start
LH: loop header
LB: loop body
LE: loop exit
PB: predicated region body
PF: predicated region fallthrough
CT: control target
= control target key end

     0   :  { %v118_v2 = vmov 2   ;;  %s119_s16 = smov 1   ;;  %s158_s0 = inlined_call_operand.vmem [shape: f32[8,16], index: 0, kind: input, shape index: {}]   ;;  %s159_s1 = inlined_call_operand.vmem [shape: f32[8,3], index: 1, kind: input, shape index: {}]   ;;  %s160_s2 = inlined_call_operand.vmem [shape: f32[8,1], index: 2, kind: input, shape index: {}]   ;;  %s161_s3 = inlined_call_operand.hbm [shape: f32[8,16], index: 3, kind: output, shape index: {}]  }
   0x1   :  { %v19_v0 = vld [vmem:[%s158_s0] sm:$0xff]  ;;  %88 = vset.pattern.permute.xlu1 %v118_v2 }
   0x2   :  { %v26_v1 = vld [vmem:[%s159_s1] sm:$0xff]  ;;  %21 = vrot.lane.b32.xlu0 %v19_v0, %s119_s16 }
   0x3   :  { %v34_v3 = vld [vmem:[%s160_s2] sm:$0xff] }
   0x4   :  { %8 = vsyncpa [#allocation4], 0  ;;  %52 = vperm.xlu1 %88, %v26_v1   ;;  %v120_v4 = vmov 1   ;;  %v121_v5 = vmov 0   ;;  %vm15_vm0 = vcmask 7168   ;;  %v122_v6 = vmov 0.0  }
   0x5   :  { %87 = vset.pattern.permute.xlu0 %v120_v4  ;;  %90 = vset.pattern.permute.xlu2 %v121_v5  ;;  %16 = vst.msk [vmem:[#allocation2] sm:$0xff] %vm15_vm0, %v122_v6  ;;  %vm17_vm1 = vcmask 146568   ;;  %vm24_vm2 = vcmask 138248   ;;  %s123_s0 = smov 126   ;;  %s124_s1 = smov 127   ;;  %vm61_vm3 = vcmask 130048  }
   0x6   :  { %37 = vperm.xlu2 %90, %v34_v3   ;;  %18 = vst.msk [vmem:[#allocation2] sm:$0xff] %vm17_vm1, %v122_v6  ;;  %s125_s2 = smov [#allocation3]   ;;  %s70_s22 = sshll.u32 %s161_s3, 4  ;;  %s71_s22 = int_to_ptr.hbm [resolvable:$true] %s70_s22 }
   0x7   :  { %s68_s19 = sshll.u32 %s125_s2, 4  ;;  %s69_s19 = int_to_ptr.vmem [resolvable:$true] %s68_s19 }
   0xa   :  { %42 = vperm.xlu0 %87, %v26_v1  }
   0xc   :  { %89 = vset.pattern.permute.xlu1 %v121_v5 }
   0xd   :  { %30 = vperm.xlu1 %89, %v26_v1  }
  0x12   :  { %91 = vset.pattern.permute.xlu0 %v118_v2 }
  0x60   :  { %v38_v13 = vpop.permute.xlu2 %37 }
  0x74   :  { %v22_v7 = vpop.permute.xlu0 %21 }
  0x75   :  { %25 = vst.msk [vmem:[#allocation2] sm:$0xff] %vm24_vm2, %v22_v7 }
  0x76   :  { %v53_v8 = vpop.permute.xlu1 %52 }
  0x7c   :  { %v27_v9 = vld [vmem:[#allocation2] sm:$0xff]  ;;  %v43_v10 = vpop.permute.xlu0 %42 }
  0x7d   :  { %v55_v11 = vmul.f32 %v53_v8, %v27_v9  ;;  %v45_v12 = vmul.f32 %v43_v10, %v27_v9 }
  0x7f   :  { %57 = vrot.lane.b32.xlu1 %v55_v11, %s123_s0  ;;  %47 = vrot.lane.b32.xlu2 %v45_v12, %s124_s1  ;;  %v31_v14 = vpop.permute.xlu1 %30 }
  0x80   :  { %v33_v15 = vmul.f32 %v31_v14, %v27_v9 }
  0x82   :  { %v40_v17 = vadd.f32 %v38_v13, %v33_v15 }
  0xd9   :  { %v48_v16 = vpop.permute.xlu2 %47 }
  0xda   :  { %v50_v18 = vadd.f32 %v48_v16, %v40_v17 }
  0xf1   :  { %v58_v19 = vpop.permute.xlu1 %57 }
  0xf2   :  { %v60_v20 = vadd.f32 %v58_v19, %v50_v18 }
  0xf4   :  { %62 = vst.msk [vmem:[#allocation3] sm:$0xff] %vm61_vm3, %v60_v20 }
  0xf5   :  { %73 = dma.vmem_to_hbm [thread:$0]  %s69_s19, 128, %s71_s22, [#allocation4]  }
  0xf6   :  { %116 = dma.done.wait [#allocation4], 128  }
  0xf7   :  { %117 = vsyncadd [#allocation4], 4294967168 }
  0xf8   :  { %78 = vsyncpa [#allocation4], 1 }

</bundles_post_ra>
